<compile_context>
chip_gen: v7x
topology: tpu7x:2x2x1
jax: 0.10.0
libtpu: 0.0.40
codegen_flags: <defaults>
</compile_context>

<pallas_src>
import jax
import jax.numpy as jnp
from jax.experimental import pallas as pl
from jax.experimental.pallas import tpu as pltpu

_LANE = 128
_ROW_GRAIN = 32                    # packed sublane tile: 8 f32 / 16 bf16 / 32 int8
_SMALL_UNALIGNED_ELEMS = 1 << 15   # fallback-only: single (1, N) block threshold
_MAX_OUTSTANDING_DMAS = 8          # DMA path: chunks kept in flight
_MIN_DMA_CHUNK_BYTES = 2 << 20     # DMA path: don't split below ~2 MiB per chunk
_CHUNK_ALIGN_ELEMS = 1024          # DMA path: chunk starts land on 1024-elem boundaries


# ----------------------------------------------------------------------------
# Shape resolution (torch.reshape semantics, incl. a single -1)
# ----------------------------------------------------------------------------
def _resolve_dims(total, dims):
    dims = list(dims)
    if dims.count(-1) > 1:
        raise ValueError("only one dimension can be -1")
    if -1 in dims:
        known = 1
        for d in dims:
            if d != -1:
                known *= d
        if known == 0 or total % known != 0:
            raise ValueError(f"cannot reshape {total} elements into {tuple(dims)}")
        dims[dims.index(-1)] = total // known
    prod = 1
    for d in dims:
        prod *= d
    if prod != total:
        raise ValueError(f"cannot reshape {total} elements into {tuple(dims)}")
    return tuple(dims)


# ----------------------------------------------------------------------------
# Primary path: direct HBM -> HBM DMA memcpy (no VMEM staging at all)
# ----------------------------------------------------------------------------
def _build_chunks(total, itemsize):
    """Static (start, size) chunks of the flat buffer, aligned starts."""
    total_bytes = total * itemsize
    n = int(max(1, min(_MAX_OUTSTANDING_DMAS, total_bytes // _MIN_DMA_CHUNK_BYTES)))
    if n == 1 or total <= _CHUNK_ALIGN_ELEMS:
        return [(0, total)]
    per = -(-total // n)                                   # ceil(total / n)
    per = -(-per // _CHUNK_ALIGN_ELEMS) * _CHUNK_ALIGN_ELEMS
    chunks = []
    start = 0
    while start < total:
        size = min(per, total - start)
        chunks.append((start, size))
        start += size
    return chunks


def _dma_memcpy_flat(flat):
    """Copy a flat 1-D array with a few outstanding HBM->HBM DMAs."""
    total = flat.shape[0]
    itemsize = flat.dtype.itemsize
    chunks = _build_chunks(total, itemsize)
    n_chunks = len(chunks)

    def kernel(x_hbm, o_hbm, sem):
        def copy(i, start, size):
            if start == 0 and size == total:
                src, dst = x_hbm, o_hbm
            else:
                src = x_hbm.at[pl.ds(start, size)]
                dst = o_hbm.at[pl.ds(start, size)]
            return pltpu.make_async_copy(src, dst, sem.at[i])

        # Issue every chunk first (several DMAs in flight), then wait on all.
        for i, (start, size) in enumerate(chunks):
            copy(i, start, size).start()
        for i, (start, size) in enumerate(chunks):
            copy(i, start, size).wait()

    return pl.pallas_call(
        kernel,
        out_shape=jax.ShapeDtypeStruct((total,), flat.dtype),
        in_specs=[pl.BlockSpec(memory_space=pl.ANY)],
        out_specs=pl.BlockSpec(memory_space=pl.ANY),
        scratch_shapes=[pltpu.SemaphoreType.DMA((n_chunks,))],
        cost_estimate=pl.CostEstimate(
            flops=0, transcendentals=0, bytes_accessed=2 * total * itemsize),
    )(flat)


_DMA_PATH_OK = None


def _dma_path_available():
    """Probe once whether the direct HBM->HBM DMA memcpy lowers & runs here."""
    global _DMA_PATH_OK
    if _DMA_PATH_OK is None:
        try:
            probe = jnp.arange(_CHUNK_ALIGN_ELEMS, dtype=jnp.float32)
            out = jax.block_until_ready(_dma_memcpy_flat(probe))
            _DMA_PATH_OK = bool(jnp.array_equal(out, probe))
        except Exception:
            _DMA_PATH_OK = False
    return _DMA_PATH_OK


# ----------------------------------------------------------------------------
# Fallback path: lane-dense BlockSpec HBM -> VMEM -> HBM copy
# ----------------------------------------------------------------------------
def _copy_kernel(x_ref, o_ref):
    # A reshape's "compute" is just moving bytes; row-major order is preserved.
    o_ref[...] = x_ref[...]


def _vmem_budget():
    """(target_block_bytes, vmem_limit_bytes), generation aware."""
    vmem_cap = None
    try:
        info = pltpu.get_tpu_info()
        vmem_cap = getattr(info, "vmem_capacity_bytes", None)
    except Exception:
        vmem_cap = None
    if vmem_cap is not None and vmem_cap >= 100 * 1024 * 1024:
        # v5e / v6e: 128 MiB VMEM, lower HBM BW -> bigger blocks are free.
        return 4 << 20, 48 << 20
    # v7x (64 MiB VMEM, ~3.2 TB/s HBM) or unknown: 2 MiB blocks amortize the
    # ~0.35 us per-grid-step overhead while double-buffered in+out blocks stay
    # far below the physical VMEM limit.
    return 2 << 20, 24 << 20


def _pick_cols(total):
    # Widest lane-dense last dim dividing the flat length: fewer, larger,
    # fully unmasked DMA descriptors / vector stores per block.
    for c in (1024, 512, 256, 128):
        if total % c == 0:
            return c
    return None


def _pallas_copy_2d(flat2d):
    """Fallback copy of a 2-D slab with large lane-dense blocks."""
    rows, cols = flat2d.shape
    itemsize = flat2d.dtype.itemsize
    target_block_bytes, vmem_cap = _vmem_budget()

    if rows >= _ROW_GRAIN and cols % _LANE == 0:
        max_rows = max(
            _ROW_GRAIN,
            (target_block_bytes // (cols * itemsize)) // _ROW_GRAIN * _ROW_GRAIN)
        block_rows = max(_ROW_GRAIN, min((rows // _ROW_GRAIN) * _ROW_GRAIN, max_rows))
        # Keep >= 2 grid steps when possible so the "parallel" axis can be
        # sharded across both v7x TensorCores.
        if pl.cdiv(rows, block_rows) < 2 and rows >= 2 * _ROW_GRAIN:
            block_rows = max(_ROW_GRAIN, (rows // 2) // _ROW_GRAIN * _ROW_GRAIN)
        grid = (pl.cdiv(rows, block_rows),)
        block_shape = (block_rows, cols)
        index_map = lambda i: (i, 0)
    else:
        # Tiny / irregular slab: one full-extent block (always legal).
        grid = (1,)
        block_shape = (rows, cols)
        index_map = lambda i: (0, 0)

    block_bytes = block_shape[0] * block_shape[1] * itemsize
    vmem_limit = int(min(vmem_cap, max(6 * block_bytes, 4 << 20)))
    total_bytes = rows * cols * itemsize

    # TODO(synk): pipeline_mode=pl.Buffered(3) on the in_spec could hide a bit
    # more DMA-issue latency here, but this path is only a fallback for the
    # direct HBM->HBM DMA memcpy above, so it stays conservative.
    return pl.pallas_call(
        _copy_kernel,
        out_shape=jax.ShapeDtypeStruct(flat2d.shape, flat2d.dtype),
        grid=grid,
        in_specs=[pl.BlockSpec(block_shape, index_map)],
        out_specs=pl.BlockSpec(block_shape, index_map),
        compiler_params=pltpu.CompilerParams(
            dimension_semantics=("parallel",),
            vmem_limit_bytes=vmem_limit,
        ),
        cost_estimate=pl.CostEstimate(
            flops=0, transcendentals=0, bytes_accessed=2 * total_bytes),
    )(flat2d)


def _reshape_copy_fallback(flat, total):
    if total % _LANE == 0:
        cols = _pick_cols(total)
        return _pallas_copy_2d(flat.reshape(total // cols, cols)).reshape(-1)
    if total <= _SMALL_UNALIGNED_ELEMS:
        return _pallas_copy_2d(flat.reshape(1, total)).reshape(-1)
    # Large & unaligned: lane-dense head + tiny (<128 elem) tail.
    # TODO(synk): the concatenate is one extra XLA copy; the primary HBM->HBM
    # DMA path above avoids it entirely, this is only the lowering fallback.
    head = (total // _LANE) * _LANE
    cols = _pick_cols(head)
    head_out = _pallas_copy_2d(flat[:head].reshape(head // cols, cols))
    tail_out = _pallas_copy_2d(flat[head:].reshape(1, total - head))
    return jnp.concatenate([head_out.reshape(-1), tail_out.reshape(-1)])


# ----------------------------------------------------------------------------
# Public wrapper (forward pass of the `Reshape` module)
# ----------------------------------------------------------------------------
def pallas_reshape(x, dims):
    """Equivalent of `x.reshape(*dims)` with the data movement done in Pallas."""
    total = x.size
    dims = _resolve_dims(total, dims)
    if total == 0:
        return jnp.reshape(x, dims)
    flat = x.reshape(-1)  # metadata-only view of the row-major buffer
    if _dma_path_available():
        out_flat = _dma_memcpy_flat(flat)
    else:
        out_flat = _reshape_copy_fallback(flat, total)
    return out_flat.reshape(dims)


if __name__ == "__main__":
    key = jax.random.PRNGKey(0)
    k1, k2, k3, k4, k5, k6 = jax.random.split(key, 6)

    # Module-consistent small input: Reshape((2, 64, 16)) on a (2, 4, 16, 16) tensor.
    x = jax.random.normal(k1, (2, 4, 16, 16), dtype=jnp.float32)
    dims = (2, 64, 16)
    y = jax.block_until_ready(pallas_reshape(x, dims))
    ref = jnp.reshape(x, dims)
    assert y.shape == ref.shape and y.dtype == ref.dtype
    assert jnp.array_equal(y, ref)

    # -1 convention, like torch.reshape supports.
    y2 = jax.block_until_ready(pallas_reshape(x, (2, -1)))
    assert jnp.array_equal(y2, jnp.reshape(x, (2, -1)))

    # Odd leading factor, 128-aligned total (2 * 65 * 32 * 32 elements).
    x3 = jax.random.normal(k2, (2, 65, 32, 32), dtype=jnp.float32)
    y3 = jax.block_until_ready(pallas_reshape(x3, (130, 32, 32)))
    assert jnp.array_equal(y3, jnp.reshape(x3, (130, 32, 32)))

    # Small, not a multiple of 128.
    x4 = jax.random.normal(k3, (4, 3, 5, 7), dtype=jnp.float32)
    y4 = jax.block_until_ready(pallas_reshape(x4, (4, 105)))
    assert jnp.array_equal(y4, jnp.reshape(x4, (4, 105)))

    # Larger, not a multiple of 128 (previously the head+tail+concat path).
    x5 = jax.random.normal(k4, (50, 50, 17), dtype=jnp.float32)
    y5 = jax.block_until_ready(pallas_reshape(x5, (50, 850)))
    assert jnp.array_equal(y5, jnp.reshape(x5, (50, 850)))

    # Sub-32-bit dtype.
    x6 = jax.random.normal(k5, (2, 8, 16, 16), dtype=jnp.bfloat16)
    y6 = jax.block_until_ready(pallas_reshape(x6, (16, 256)))
    assert jnp.array_equal(y6, jnp.reshape(x6, (16, 256)))

    # 4 MiB tensor: exercises multiple outstanding DMA chunks.
    x7 = jax.random.normal(k6, (4, 64, 64, 64), dtype=jnp.float32)
    y7 = jax.block_until_ready(pallas_reshape(x7, (256, -1)))
    assert jnp.array_equal(y7, jnp.reshape(x7, (256, 4096)))

    print("KERNEL_OK")
</pallas_src>

<mosaic_0001>
module attributes {stable_mosaic.version = 11 : i64} {
  func.func @_copy_kernel(%arg0: i32, %arg1: memref<2x1024xf32, #tpu.memory_space<vmem>>, %arg2: memref<2x1024xf32, #tpu.memory_space<vmem>>) attributes {dimension_semantics = [#tpu.dimension_semantics<parallel>], iteration_bounds = array<i64: 1>, scalar_prefetch = 0 : i64, scratch_operands = 0 : i64, tpu.core_type = #tpu.core_type<tc>, window_params = [{pipeline_mode = #tpu.pipeline_mode<synchronous>, transform_indices = @transform_0, window_bounds = array<i64: 2, 1024>}, {pipeline_mode = #tpu.pipeline_mode<synchronous>, transform_indices = @transform_1, window_bounds = array<i64: 2, 1024>}]} {
    %c0 = arith.constant 0 : index
    %c0_0 = arith.constant 0 : index
    %0 = vector.load %arg1[%c0, %c0_0] : memref<2x1024xf32, #tpu.memory_space<vmem>>, vector<2x1024xf32>
    %c0_1 = arith.constant 0 : index
    %c0_2 = arith.constant 0 : index
    %1 = vector.load %arg2[%c0_1, %c0_2] : memref<2x1024xf32, #tpu.memory_space<vmem>>, vector<2x1024xf32>
    tpu.vector_store %arg2[%c0_1, %c0_2], %0 {strides = array<i32>} : memref<2x1024xf32, #tpu.memory_space<vmem>>, vector<2x1024xf32>,
    return
  }
  func.func @transform_0(%arg0: i32) -> (i32, i32) {
    %c0_i32 = arith.constant 0 : i32
    %c0_i32_0 = arith.constant 0 : i32
    %c0_i32_1 = arith.constant 0 : i32
    return %c0_i32, %c0_i32_0 : i32, i32
  }
  func.func @transform_1(%arg0: i32) -> (i32, i32) {
    %c0_i32 = arith.constant 0 : i32
    %c0_i32_0 = arith.constant 0 : i32
    %c0_i32_1 = arith.constant 0 : i32
    return %c0_i32, %c0_i32_0 : i32, i32
  }
}

</mosaic_0001>

<bundles_post_ra>
// kernel: tpu_custom_call.1
= control target key start
LH: loop header
LB: loop body
LE: loop exit
PB: predicated region body
PF: predicated region fallthrough
CT: control target
= control target key end

     0   :  { %6 = vsyncpa [#allocation3], 0  ;;  %s126_s0 = inlined_call_operand.hbm [shape: f32[2,1024], index: 0, kind: input, shape index: {}]   ;;  %s127_s1 = inlined_call_operand.hbm [shape: f32[2,1024], index: 1, kind: output, shape index: {}]  }
   0x1   :  { %7 = vsyncpa [#allocation4], 0  ;;  %s90_s6 = smov [#allocation2]   ;;  %s42_s10 = scalar_lea.hbm %s126_s0, 256 }
   0x2   :  { %s14_s7 = sshll.u32 %s90_s6, 4  ;;  %p43_p0 = scmp.ne.s32.totalorder %s126_s0, %s42_s10  ;;  %s15_s7 = int_to_ptr.vmem [resolvable:$true] %s14_s7 }
   0x3   :  { %p46_p1 = scmp.lt.u32.totalorder %s42_s10, %s126_s0 }
   0x5   :  { %p48_p2 = pnand %p46_p1, %p43_p0 }
   0x7   :  { %51 = shalt.err (!%p48_p2)
}
   0x8   :  { %s52_s15 = scalar_lea.vmem %s15_s7, 256  ;;  %p57_p4 = scmp.lt.s32.totalorder %s15_s7, %s15_s7 }
   0x9   :  { %p53_p3 = scmp.ne.s32.totalorder %s15_s7, %s52_s15  ;;  %p58_p5 = scmp.lt.s32.totalorder %s52_s15, %s52_s15 }
   0xb   :  { %p59_p6 = por %p58_p5, %p57_p4 }
   0xd   :  { %p60_p7 = pnand %p59_p6, %p53_p3 }
   0xf   :  { %63 = shalt.err (!%p60_p7)
}
  0x10   :  { %17 = dma.hbm_to_vmem [thread:$0]  %s126_s0, 256, %s15_s7, [#allocation3]  }
  0x11   :  { %86 = dma.done.wait [#allocation3], 256  }
  0x12   :  { %87 = vsyncadd [#allocation3], 4294967040  ;;  %s91_s18 = smov [#allocation5]   ;;  %v21_v0 = vld [vmem:[#allocation2] sm:$0xff]  ;;  %v22_v1 = vld [vmem:[#allocation2 + $0x8] sm:$0xff] }
  0x13   :  { %s31_s19 = sshll.u32 %s91_s18, 4  ;;  %23 = vst [vmem:[#allocation5] sm:$0xff] %v21_v0  ;;  %24 = vst [vmem:[#allocation5 + $0x8] sm:$0xff] %v22_v1  ;;  %s32_s19 = int_to_ptr.vmem [resolvable:$true] %s31_s19 }
  0x14   :  { %s64_s20 = scalar_lea.vmem %s32_s19, 256  ;;  %p69_p9 = scmp.lt.s32.totalorder %s32_s19, %s32_s19 }
  0x15   :  { %p65_p8 = scmp.ne.s32.totalorder %s32_s19, %s64_s20  ;;  %p70_p10 = scmp.lt.s32.totalorder %s64_s20, %s64_s20 }
  0x17   :  { %p71_p11 = por %p70_p10, %p69_p9 }
  0x19   :  { %p72_p12 = pnand %p71_p11, %p65_p8 }
  0x1b   :  { %75 = shalt.err (!%p72_p12)
}
  0x1c   :  { %s76_s0 = scalar_lea.hbm %s127_s1, 256 }
  0x1d   :  { %p77_p13 = scmp.ne.s32.totalorder %s127_s1, %s76_s0  ;;  %p80_p0 = scmp.lt.u32.totalorder %s76_s0, %s127_s1 }
  0x1f   :  { %p82_p1 = pnand %p80_p0, %p77_p13 }
  0x21   :  { %85 = shalt.err (!%p82_p1)
}
  0x22   :  { %34 = dma.vmem_to_hbm [thread:$0]  %s32_s19, 256, %s127_s1, [#allocation4]  }
  0x23   :  { %88 = dma.done.wait [#allocation4], 256  }
  0x24   :  { %89 = vsyncadd [#allocation4], 4294967040 }
  0x25   :  { %38 = vsyncpa [#allocation3], 1 }
  0x26   :  { %39 = vsyncpa [#allocation4], 1 }

</bundles_post_ra>
